<compile_context>
chip_gen: v7x
topology: tpu7x:2x2x1
jax: 0.10.0
libtpu: 0.0.40
codegen_flags: <defaults>
</compile_context>

<pallas_src>
import math

import jax
import jax.numpy as jnp
from jax.experimental import pallas as pl
from jax.experimental.pallas import tpu as pltpu


def get_k_index_product_set(num_k_x: int, num_k_y: int, num_k_z: int) -> jnp.ndarray:
    """JAX re-implementation of the torch helper (same ordering as cartesian_prod)."""
    ax = jnp.arange(-num_k_x, num_k_x + 1)
    ay = jnp.arange(-num_k_y, num_k_y + 1)
    az = jnp.arange(-num_k_z, num_k_z + 1)
    gx, gy, gz = jnp.meshgrid(ax, ay, az, indexing="ij")
    prod = jnp.stack([gx, gy, gz], axis=-1).reshape(-1, 3)
    n = prod.shape[0]
    prod = prod[n // 2 + 1:]
    return prod.astype(jnp.float32)


def _round_up(x: int, m: int) -> int:
    return ((x + m - 1) // m) * m


def _ewald_kdotr_kernel(p_ref, kset_ref, out_ref):
    # p:    (TA, 3)      per-atom k_cell@pos vectors (f32)
    # kset: (3, Kp)      k-index product set, transposed + zero-padded (f32)
    # out:  (TA, Kp)     k_dot_r tile, lane-dense (Kp % 128 == 0), target dtype
    p = p_ref[...].astype(jnp.float32)
    ks = kset_ref[...]
    # depth-3 contraction as 3 unrolled broadcast FMAs on the VPU
    # (kernel is HBM-write-bound, so compute unit choice is irrelevant; this
    #  avoids a wasteful 3-deep MXU matmul).
    out = (p[:, 0:1] * ks[0:1, :]
           + p[:, 1:2] * ks[1:2, :]
           + p[:, 2:3] * ks[2:3, :])
    out_ref[...] = out.astype(out_ref.dtype)   # single cast at the store


def _choose_tile(n_atoms, k_pad, out_itemsize, tile_atoms, vmem_block_budget):
    """Pick the atom tile from a VMEM block budget; prefer exact divisors of N."""
    # Double-buffered pipeline block bytes per atom:
    #   p block (tile, 3) f32, lane-padded to 128 lanes  -> 512 B/atom/buffer
    #   out block (tile, k_pad)                          -> k_pad*itemsize B/atom/buffer
    bytes_per_atom = 2 * (512 + k_pad * out_itemsize)
    cap = max(8, (int(vmem_block_budget) // bytes_per_atom) // 8 * 8)
    if tile_atoms is not None:
        cap = max(8, min(cap, _round_up(int(tile_atoms), 8)))
    # keep >= 2 grid steps whenever N allows (v7x has 2 TensorCores per chip)
    half = max(8, _round_up((n_atoms + 1) // 2, 8))
    cap = min(cap, half)

    tile = None
    if n_atoms % 8 == 0:
        # largest multiple-of-8 divisor of N in [cap/2, cap]: no padded rows,
        # so no row slice after the kernel.
        floor_t = max(8, (cap // 2 // 8) * 8)
        t = cap
        while t >= floor_t:
            if n_atoms % t == 0:
                tile = t
                break
            t -= 8
    if tile is None:
        tile = cap                      # pad the atom axis; slice rows afterwards
    n_pad = _round_up(n_atoms, tile)
    return tile, n_pad


def ewald_initial_pbc(cell, batch, pos, k_index_product_set, down_projection,
                      *, out_dtype=None, tile_atoms=None, vmem_block_budget=None):
    """Pallas-backed forward of EwaldInitialPBC. Returns a dict like the module.

    out_dtype: dtype of k_dot_r emitted by the kernel (default pos.dtype;
               pass jnp.bfloat16 to halve the dominant HBM write stream if the
               downstream cos/sin + projection tolerates it).
    """
    n_atoms = pos.shape[0]
    num_k = k_index_product_set.shape[0]
    out_dtype = jnp.dtype(pos.dtype if out_dtype is None else out_dtype)

    # --- glue in plain JAX: tiny 3x3 inverse, per-atom gather, 3x3 @ 3 contraction ---
    k_cell = 2.0 * jnp.pi * jnp.linalg.inv(cell)                        # (B, 3, 3)
    kcell_atoms = jnp.take(k_cell, batch, axis=0)                       # (N, 3, 3)
    # p[a, j] = sum_i k_cell[batch[a], j, i] * pos[a, i]
    p = jnp.einsum("aji,ai->aj", kcell_atoms, pos).astype(jnp.float32)  # (N, 3)
    # TODO(synk): for very large N, fold the gather + 3x3 contraction into the
    # kernel via SMEM-prefetched k_cell / per-tile batch ids (few-% HBM saving).

    # --- lane-dense output: pad K to a multiple of 128, zero-fill extra cols ---
    k_pad = _round_up(max(num_k, 128), 128)
    kset_t = jnp.zeros((3, k_pad), jnp.float32)
    kset_t = kset_t.at[:, :num_k].set(k_index_product_set.T.astype(jnp.float32))

    # --- VMEM budget -> atom tile (generation-aware via get_tpu_info) ---
    if vmem_block_budget is None:
        try:
            vmem_cap = int(pltpu.get_tpu_info().vmem_capacity_bytes)
        except Exception:
            vmem_cap = 64 * 1024 * 1024          # conservative fallback (v7x per-TC)
        # ~1/5 of physical VMEM for pipeline blocks, capped at 24 MiB
        vmem_block_budget = min(vmem_cap // 5, 24 * 1024 * 1024)
    tile, n_pad = _choose_tile(n_atoms, k_pad, out_dtype.itemsize,
                               tile_atoms, vmem_block_budget)
    if n_pad != n_atoms:
        p = jnp.pad(p, ((0, n_pad - n_atoms), (0, 0)))

    # Raise the scoped-VMEM limit so large tiles work on v5e's 16 MiB default too.
    block_bytes = 2 * tile * (512 + k_pad * out_dtype.itemsize) + 2 * 8 * k_pad * 4
    vmem_limit = int(max(32 * 1024 * 1024, block_bytes + 8 * 1024 * 1024))

    grid = (n_pad // tile,)
    out_padded = pl.pallas_call(
        _ewald_kdotr_kernel,
        out_shape=jax.ShapeDtypeStruct((n_pad, k_pad), out_dtype),
        grid_spec=pltpu.PrefetchScalarGridSpec(
            num_scalar_prefetch=0,
            grid=grid,
            in_specs=[
                pl.BlockSpec((tile, 3), lambda i: (i, 0)),       # p tile
                pl.BlockSpec((3, k_pad), lambda i: (0, 0)),      # kset (revisited, not re-DMA'd)
            ],
            out_specs=pl.BlockSpec((tile, k_pad), lambda i: (i, 0)),
        ),
        compiler_params=pltpu.CompilerParams(
            dimension_semantics=("parallel",),                   # v7x: shard tiles across TCs
            vmem_limit_bytes=vmem_limit),
    )(p, kset_t)

    # No astype pass: the kernel already emitted out_dtype.  Only slice what
    # padding added (narrow, and fusible into the consumer under jit).
    k_dot_r = out_padded
    if n_pad != n_atoms:
        k_dot_r = k_dot_r[:n_atoms]
    if k_pad != num_k:
        k_dot_r = k_dot_r[:, :num_k]
    # TODO(synk): consumers that accept a transposed (K, N) layout could take an
    # atoms-on-lanes output (K padded to 8 sublanes, ~2x fewer write bytes for
    # small K); not done here to preserve the module's (N, K) contract.

    return {
        "k_dot_r": k_dot_r,                                      # (N_atoms, K)
        "sinc_damping": jnp.asarray(1.0, dtype=pos.dtype),       # scalar, matches module
        "down_projection": down_projection,                      # (K, P) passthrough
    }


if __name__ == "__main__":
    key = jax.random.PRNGKey(0)
    cellkey, poskey, projkey = jax.random.split(key, 3)

    # module configuration
    num_k_points = [2, 2, 2]          # -> K = (5*5*5)//2 = 62
    projection_dim = 8
    kset = get_k_index_product_set(*num_k_points)                # (62, 3)
    num_k = kset.shape[0]

    # deterministic xavier_uniform init for down_projection (shape (K, P))
    bound = math.sqrt(6.0 / (num_k + projection_dim))
    down_projection = jax.random.uniform(
        projkey, (num_k, projection_dim), dtype=jnp.float32,
        minval=-bound, maxval=bound)

    # small synthetic "data" dict inputs
    batch_size = 2
    n_atoms = 512
    cell = (jnp.eye(3, dtype=jnp.float32)[None] * 4.0
            + 0.1 * jax.random.normal(cellkey, (batch_size, 3, 3), jnp.float32))
    batch = jnp.repeat(jnp.arange(batch_size, dtype=jnp.int32), n_atoms // batch_size)
    pos = jax.random.normal(poskey, (n_atoms, 3), jnp.float32) * 2.0

    out = ewald_initial_pbc(cell, batch, pos, kset, down_projection)
    jax.block_until_ready(out["k_dot_r"])

    # pure-JAX reference (mirrors the torch forward exactly)
    k_cell_ref = 2.0 * jnp.pi * jnp.linalg.inv(cell)
    k_grid = jnp.einsum("kj,bji->bki", kset, k_cell_ref)          # torch.matmul broadcast
    k_dot_r_ref = jnp.einsum("aki,ai->ak", k_grid[batch], pos)

    assert out["k_dot_r"].shape == (n_atoms, num_k)
    assert out["k_dot_r"].dtype == pos.dtype
    assert out["down_projection"].shape == (num_k, projection_dim)
    assert float(out["sinc_damping"]) == 1.0
    assert jnp.allclose(out["k_dot_r"], k_dot_r_ref, atol=1e-4, rtol=1e-4)

    # bf16 fast path: kernel accumulates in f32, rounds once at the store.
    out_bf16 = ewald_initial_pbc(cell, batch, pos, kset, down_projection,
                                 out_dtype=jnp.bfloat16)
    jax.block_until_ready(out_bf16["k_dot_r"])
    assert out_bf16["k_dot_r"].dtype == jnp.bfloat16
    assert out_bf16["k_dot_r"].shape == (n_atoms, num_k)
    assert float(jnp.max(jnp.abs(out_bf16["k_dot_r"].astype(jnp.float32)
                                 - k_dot_r_ref))) < 0.5

    print("KERNEL_OK")
</pallas_src>

<mosaic_0001>
module attributes {stable_mosaic.version = 11 : i64} {
  func.func @_ewald_kdotr_kernel(%arg0: i32, %arg1: memref<256x3xf32, #tpu.memory_space<vmem>>, %arg2: memref<3x128xf32, #tpu.memory_space<vmem>>, %arg3: memref<256x128xf32, #tpu.memory_space<vmem>>) attributes {dimension_semantics = [#tpu.dimension_semantics<parallel>], iteration_bounds = array<i64: 2>, scalar_prefetch = 0 : i64, scratch_operands = 0 : i64, tpu.core_type = #tpu.core_type<tc>, window_params = [{transform_indices = @transform_0, window_bounds = array<i64: 256, 3>}, {pipeline_mode = #tpu.pipeline_mode<synchronous>, transform_indices = @transform_1, window_bounds = array<i64: 3, 128>}, {transform_indices = @transform_2, window_bounds = array<i64: 256, 128>}]} {
    %c0 = arith.constant 0 : index
    %c0_0 = arith.constant 0 : index
    %0 = vector.load %arg1[%c0, %c0_0] : memref<256x3xf32, #tpu.memory_space<vmem>>, vector<256x3xf32>
    %c0_1 = arith.constant 0 : index
    %c0_2 = arith.constant 0 : index
    %1 = vector.load %arg2[%c0_1, %c0_2] : memref<3x128xf32, #tpu.memory_space<vmem>>, vector<3x128xf32>
    %2 = vector.extract_strided_slice %0 {offsets = [0, 0], sizes = [256, 1], strides = [1, 1]} : vector<256x3xf32> to vector<256x1xf32>
    %3 = vector.extract_strided_slice %1 {offsets = [0, 0], sizes = [1, 128], strides = [1, 1]} : vector<3x128xf32> to vector<1x128xf32>
    %4 = vector.broadcast %2 : vector<256x1xf32> to vector<256x128xf32>
    %5 = vector.broadcast %3 : vector<1x128xf32> to vector<256x128xf32>
    %6 = arith.mulf %4, %5 : vector<256x128xf32>
    %7 = vector.extract_strided_slice %0 {offsets = [0, 1], sizes = [256, 1], strides = [1, 1]} : vector<256x3xf32> to vector<256x1xf32>
    %8 = vector.extract_strided_slice %1 {offsets = [1, 0], sizes = [1, 128], strides = [1, 1]} : vector<3x128xf32> to vector<1x128xf32>
    %9 = vector.broadcast %7 : vector<256x1xf32> to vector<256x128xf32>
    %10 = vector.broadcast %8 : vector<1x128xf32> to vector<256x128xf32>
    %11 = arith.mulf %9, %10 : vector<256x128xf32>
    %12 = arith.addf %6, %11 : vector<256x128xf32>
    %13 = vector.extract_strided_slice %0 {offsets = [0, 2], sizes = [256, 1], strides = [1, 1]} : vector<256x3xf32> to vector<256x1xf32>
    %14 = vector.extract_strided_slice %1 {offsets = [2, 0], sizes = [1, 128], strides = [1, 1]} : vector<3x128xf32> to vector<1x128xf32>
    %15 = vector.broadcast %13 : vector<256x1xf32> to vector<256x128xf32>
    %16 = vector.broadcast %14 : vector<1x128xf32> to vector<256x128xf32>
    %17 = arith.mulf %15, %16 : vector<256x128xf32>
    %18 = arith.addf %12, %17 : vector<256x128xf32>
    %c0_3 = arith.constant 0 : index
    %c0_4 = arith.constant 0 : index
    %19 = vector.load %arg3[%c0_3, %c0_4] : memref<256x128xf32, #tpu.memory_space<vmem>>, vector<256x128xf32>
    tpu.vector_store %arg3[%c0_3, %c0_4], %18 {strides = array<i32>} : memref<256x128xf32, #tpu.memory_space<vmem>>, vector<256x128xf32>,
    return
  }
  func.func @transform_0(%arg0: i32) -> (i32, i32) {
    %c0_i32 = arith.constant 0 : i32
    %c0_i32_0 = arith.constant 0 : i32
    return %arg0, %c0_i32 : i32, i32
  }
  func.func @transform_1(%arg0: i32) -> (i32, i32) {
    %c0_i32 = arith.constant 0 : i32
    %c0_i32_0 = arith.constant 0 : i32
    %c0_i32_1 = arith.constant 0 : i32
    return %c0_i32, %c0_i32_0 : i32, i32
  }
  func.func @transform_2(%arg0: i32) -> (i32, i32) {
    %c0_i32 = arith.constant 0 : i32
    %c0_i32_0 = arith.constant 0 : i32
    return %arg0, %c0_i32 : i32, i32
  }
}

</mosaic_0001>

<bundles_post_ra>
// kernel: tpu_custom_call.1
= control target key start
LH: loop header
LB: loop body
LE: loop exit
PB: predicated region body
PF: predicated region fallthrough
CT: control target
= control target key end

     0   :  { %7 = vsyncpa [#allocation3], 0  ;;  %s1664_s0 = inlined_call_operand.vmem [shape: f32[512,3], index: 0, kind: input, shape index: {}]   ;;  %s1665_s1 = inlined_call_operand.vmem [shape: f32[3,128], index: 1, kind: input, shape index: {}]   ;;  %s1666_s2 = inlined_call_operand.hbm [shape: f32[512,128], index: 2, kind: output, shape index: {}]  }
   0x1   :  { %9 = vsyncpa [#allocation3 + $0x1], 0  ;;  %s1022_s9 = smov 0   ;;  %s1024_s10 = smov 0  }
   0x2   :  { %s1026_s11 = smov 0   ;;  %s1028_s12 = smov 0  }
   0x3 LB: > { %s1043_s13 = sadd.s32 4294967295, %s999_s12   ;;  %s874_s14 = sadd.s32 4294967294, %s999_s12   ;;  %s999_s12 = sphi %s1028_s12, %s1674_s12   ;;  %s995_s11 = sphi %s1026_s11, %s1673_s11   ;;  %s991_s10 = sphi %s1024_s10, %s1672_s10   ;;  %s987_s9 = sphi %s1022_s9, %s1671_s9  }
   0x4   : > { %s1047_s15 = sadd.s32 1, %s999_s12   ;;  %s69_s16 = sadd.s32 1, %s995_s11 }
   0x5   : > { %s66_s17 = ssub.s32 %s999_s12, %s1047_s15  ;;  %p79_p0 = scmp.ne.s32.totalorder %s995_s11, %s991_s10 }
   0x6   : > { %p67_p1 = scmp.eq.s32.totalorder %s66_s17, 0  ;;  %p80_p2 = scmp.eq.s32.totalorder %s1043_s13, 1 }
   0x7   : > { %p85_p3 = scmp.ne.s32.totalorder %s991_s10, %s987_s9  ;;  %p86_p4 = scmp.eq.s32.totalorder %s874_s14, 1 }
   0x8   : > { %s1058_s18 = scalar_select %p67_p1, %s995_s11, %s69_s16  }
   0x9   : > { %p1060_p5 = por %p80_p2, %p79_p0  ;;  %p1064_p6 = por %p86_p4, %p85_p3 }
   0xa   : > { %p877_p7 = scmp.ge.s32.totalorder %s999_s12, 1  ;;  %p116_p8 = scmp.lt.s32.totalorder %s999_s12, 3 }
   0xc   : > { %p117_p9 = pnand %p877_p7, %p116_p8 }
   0xe   : > { %120 = sbr.rel (%p117_p9) target bundleno = 369 (0x171), region = 28 }
  0x15   : > { %s879_s21 = sshll.u32 %s1043_s13, 5  ;;  %v1001_v0 = vmov 0   ;;  %v1002_v33 = vmov 1   ;;  %v1003_v36 = vmov 2   ;;  %v338_v59 = vlaneseq  ;;  %s135_s28 = sand.u32 1, %s991_s10  }
  0x16   : > { %932 = vset.pattern.permute.xlu1 %v1001_v0  ;;  %931 = vset.pattern.permute.xlu0 %v1001_v0  ;;  %p139_p10 = scmp.lt.s32.totalorder %s879_s21, 63  ;;  %s878_s29 = sshll.u32 %s135_s28, 8 }
  0x17   : > { %v1312_v62 = vshrl.u32 %v338_v59, 7  ;;  %s1483_s30 = scalar_lea.vmem [#allocation2], %s878_s29  ;;  %s886_s3 = sshll.u32 %s1043_s13, 12 }
  0x18   : > { %s1676_s21 = smov (!%p139_p10, %s879_s21), 63  ;;  %s812_s4 = sshll.u32 %s1483_s30, 4  ;;  %s1617_s4 = int_to_ptr.vmem [resolvable:$true] %s812_s4 }
  0x19   : > { %s880_s22 = sshll.u32 %s1676_s21, 3  ;;  %s1615_s7 = scalar_lea.hbm %s1666_s2, %s886_s3 }
  0x1a   : > { %s1074_s25 = scalar_lea.vmem %s1664_s0, %s880_s22  ;;  %s1623_s8 = scalar_lea.sflag [#allocation3], %s135_s28 }
  0x1b   : > { %v1077_v1 = vld [vmem:[%s1074_s25 + $0x10] sm:$0xff]  ;;  %v1080_v2 = vld [vmem:[%s1074_s25] sm:$0xff]  ;;  %v1085_v3 = vld [vmem:[%s1074_s25 + $0x18] sm:$0xff]  ;;  %s937_s13 = scalar_lea.vmem %s1617_s4, 4096  ;;  %s1004_s14 = smov [#allocation2]  }
  0x1c   : > { %190 = vperm.xlu1 %932, %v1077_v1   ;;  %180 = vperm.xlu0 %931, %v1080_v2   ;;  %v1088_v4 = vld [vmem:[%s1074_s25 + $0x8] sm:$0xff]  ;;  %v1096_v6 = vld [vmem:[%s1074_s25 + $0x20] sm:$0xff]  ;;  %v1101_v7 = vld [vmem:[%s1074_s25 + $0x38] sm:$0xff]  ;;  %p938_p11 = scmp.ne.s32.totalorder %s1617_s4, %s937_s13  ;;  %s941_s16 = sshll.u32 %s1004_s14, 4  ;;  %s942_s16 = int_to_ptr.vmem [resolvable:$false] %s941_s16 }
  0x1d   : > { %v1093_v5 = vld [vmem:[%s1074_s25 + $0x28] sm:$0xff]  ;;  %v1104_v8 = vld [vmem:[%s1074_s25 + $0x30] sm:$0xff]  ;;  %v1112_v10 = vld [vmem:[%s1074_s25 + $0x40] sm:$0xff]  ;;  %s943_s17 = scalar_lea.vmem %s942_s16, 8192  ;;  %p944_p0 = scmp.lt.s32.totalorder %s1617_s4, %s942_s16 }
  0x1e   : > { %v1109_v9 = vld [vmem:[%s1074_s25 + $0x48] sm:$0xff]  ;;  %v1117_v11 = vld [vmem:[%s1074_s25 + $0x58] sm:$0xff]  ;;  %v1120_v12 = vld [vmem:[%s1074_s25 + $0x50] sm:$0xff]  ;;  %p939_p12 = pnand %p938_p11, %p1060_p5  ;;  %p945_p1 = scmp.lt.s32.totalorder %s943_s17, %s937_s13 }
  0x1f   : > { %v1125_v13 = vld [vmem:[%s1074_s25 + $0x68] sm:$0xff]  ;;  %v1128_v14 = vld [vmem:[%s1074_s25 + $0x60] sm:$0xff]  ;;  %v1133_v15 = vld [vmem:[%s1074_s25 + $0x78] sm:$0xff] }
  0x20   : > { %195 = vperm.xlu1 %932, %v1085_v3   ;;  %185 = vperm.xlu0 %931, %v1088_v4   ;;  %v1136_v16 = vld [vmem:[%s1074_s25 + $0x70] sm:$0xff]  ;;  %v1141_v17 = vld [vmem:[%s1074_s25 + $0x88] sm:$0xff]  ;;  %v1144_v18 = vld [vmem:[%s1074_s25 + $0x80] sm:$0xff]  ;;  %p940_p13 = pneg %p939_p12  ;;  %p946_p2 = por %p945_p1, %p944_p0 }
  0x21   : > { %v1149_v19 = vld [vmem:[%s1074_s25 + $0x98] sm:$0xff]  ;;  %v1152_v20 = vld [vmem:[%s1074_s25 + $0x90] sm:$0xff]  ;;  %v1157_v21 = vld [vmem:[%s1074_s25 + $0xa8] sm:$0xff] }
  0x22   : > { %v1160_v22 = vld [vmem:[%s1074_s25 + $0xa0] sm:$0xff]  ;;  %v1165_v23 = vld [vmem:[%s1074_s25 + $0xb8] sm:$0xff]  ;;  %v1168_v24 = vld [vmem:[%s1074_s25 + $0xb0] sm:$0xff]  ;;  %p947_p3 = pnand %p946_p2, %p940_p13 }
  0x23   : > { %v1173_v25 = vld [vmem:[%s1074_s25 + $0xc8] sm:$0xff]  ;;  %v1176_v26 = vld [vmem:[%s1074_s25 + $0xc0] sm:$0xff]  ;;  %v1181_v27 = vld [vmem:[%s1074_s25 + $0xd8] sm:$0xff] }
  0x24   : > { %205 = vperm.xlu1 %932, %v1093_v5   ;;  %200 = vperm.xlu0 %931, %v1096_v6   ;;  %v1184_v28 = vld [vmem:[%s1074_s25 + $0xd0] sm:$0xff]  ;;  %v1189_v29 = vld [vmem:[%s1074_s25 + $0xe8] sm:$0xff]  ;;  %v1192_v30 = vld [vmem:[%s1074_s25 + $0xe0] sm:$0xff] }
  0x25   : > { %v1197_v31 = vld [vmem:[%s1074_s25 + $0xf8] sm:$0xff]  ;;  %v1200_v32 = vld [vmem:[%s1074_s25 + $0xf0] sm:$0xff] }
  0x28   : > { %215 = vperm.xlu1 %932, %v1101_v7   ;;  %210 = vperm.xlu0 %931, %v1104_v8  }
  0x2c   : > { %225 = vperm.xlu1 %932, %v1109_v9   ;;  %220 = vperm.xlu0 %931, %v1112_v10  }
  0x30   : > { %235 = vperm.xlu1 %932, %v1117_v11   ;;  %230 = vperm.xlu0 %931, %v1120_v12  }
  0x34   : > { %245 = vperm.xlu1 %932, %v1125_v13   ;;  %240 = vperm.xlu0 %931, %v1128_v14  }
  0x38   : > { %255 = vperm.xlu1 %932, %v1133_v15   ;;  %250 = vperm.xlu0 %931, %v1136_v16  }
  0x3c   : > { %265 = vperm.xlu1 %932, %v1141_v17   ;;  %260 = vperm.xlu0 %931, %v1144_v18  }
  0x40   : > { %275 = vperm.xlu1 %932, %v1149_v19   ;;  %270 = vperm.xlu0 %931, %v1152_v20  }
  0x44   : > { %285 = vperm.xlu1 %932, %v1157_v21   ;;  %280 = vperm.xlu0 %931, %v1160_v22  }
  0x48   : > { %295 = vperm.xlu1 %932, %v1165_v23   ;;  %290 = vperm.xlu0 %931, %v1168_v24  }
  0x4c   : > { %305 = vperm.xlu1 %932, %v1173_v25   ;;  %300 = vperm.xlu0 %931, %v1176_v26  }
  0x50   : > { %315 = vperm.xlu1 %932, %v1181_v27   ;;  %310 = vperm.xlu0 %931, %v1184_v28  }
  0x54   : > { %325 = vperm.xlu1 %932, %v1189_v29   ;;  %320 = vperm.xlu0 %931, %v1192_v30  }
  0x58   : > { %335 = vperm.xlu1 %932, %v1197_v31   ;;  %330 = vperm.xlu0 %931, %v1200_v32  }
  0x5c   : > { %934 = vset.pattern.permute.xlu1 %v1002_v33  ;;  %933 = vset.pattern.permute.xlu0 %v1002_v33 }
  0x5d   : > { %379 = vperm.xlu1 %934, %v1088_v4   ;;  %375 = vperm.xlu0 %933, %v1080_v2  }
  0x61   : > { %383 = vperm.xlu1 %934, %v1077_v1   ;;  %387 = vperm.xlu0 %933, %v1085_v3  }
  0x65   : > { %391 = vperm.xlu1 %934, %v1096_v6   ;;  %395 = vperm.xlu0 %933, %v1093_v5  }
  0x69   : > { %399 = vperm.xlu1 %934, %v1104_v8   ;;  %403 = vperm.xlu0 %933, %v1101_v7  }
  0x6d   : > { %407 = vperm.xlu1 %934, %v1112_v10   ;;  %411 = vperm.xlu0 %933, %v1109_v9  }
  0x71   : > { %415 = vperm.xlu1 %934, %v1120_v12   ;;  %419 = vperm.xlu0 %933, %v1117_v11  }
  0x75   : > { %423 = vperm.xlu1 %934, %v1128_v14   ;;  %427 = vperm.xlu0 %933, %v1125_v13  }
  0x79   : > { %431 = vperm.xlu1 %934, %v1136_v16   ;;  %435 = vperm.xlu0 %933, %v1133_v15  }
  0x7d   : > { %439 = vperm.xlu1 %934, %v1144_v18   ;;  %443 = vperm.xlu0 %933, %v1141_v17  }
  0x81   : > { %447 = vperm.xlu1 %934, %v1152_v20   ;;  %451 = vperm.xlu0 %933, %v1149_v19  }
  0x85   : > { %455 = vperm.xlu1 %934, %v1160_v22   ;;  %459 = vperm.xlu0 %933, %v1157_v21  }
  0x89   : > { %463 = vperm.xlu1 %934, %v1168_v24   ;;  %467 = vperm.xlu0 %933, %v1165_v23  }
  0x8d   : > { %471 = vperm.xlu1 %934, %v1176_v26   ;;  %475 = vperm.xlu0 %933, %v1173_v25  }
  0x91   : > { %479 = vperm.xlu1 %934, %v1184_v28   ;;  %483 = vperm.xlu0 %933, %v1181_v27  }
  0x95   : > { %487 = vperm.xlu1 %934, %v1192_v30   ;;  %491 = vperm.xlu0 %933, %v1189_v29  }
  0x99   : > { %495 = vperm.xlu1 %934, %v1200_v32   ;;  %499 = vperm.xlu0 %933, %v1197_v31  }
  0x9b   : > { %v1236_v34 = vpop.permute.xlu1 %190  ;;  %v1238_v35 = vpop.permute.xlu0 %180 }
  0x9d   : > { %935 = vset.pattern.permute.xlu1 %v1003_v36  ;;  %936 = vset.pattern.permute.xlu0 %v1003_v36 }
  0x9e   : > { %571 = vperm.xlu1 %935, %v1080_v2   ;;  %575 = vperm.xlu0 %936, %v1088_v4   ;;  %v1326_v2 = vld [vmem:[%s1665_s1] sm:$0x7] }
  0x9f   : > { %v1242_v37 = vpop.permute.xlu1 %195  ;;  %v1244_v38 = vpop.permute.xlu0 %185 }
  0xa2   : > { %579 = vperm.xlu1 %935, %v1077_v1   ;;  %587 = vperm.xlu0 %936, %v1096_v6   ;;  %v340_v1 = vsub.s32 0, %v1312_v62 }
  0xa3   : > { %v1248_v39 = vpop.permute.xlu1 %205  ;;  %v1250_v40 = vpop.permute.xlu0 %200 }
  0xa6   : > { %583 = vperm.xlu1 %935, %v1085_v3   ;;  %595 = vperm.xlu0 %936, %v1104_v8  }
  0xa7   : > { %v1254_v41 = vpop.permute.xlu1 %215  ;;  %v1256_v42 = vpop.permute.xlu0 %210 }
  0xaa   : > { %591 = vperm.xlu1 %935, %v1093_v5   ;;  %603 = vperm.xlu0 %936, %v1112_v10   ;;  %v1333_v5 = vrot.slane %v1326_v2, %v340_v1 }
  0xab   : > { %v1260_v43 = vpop.permute.xlu1 %225  ;;  %v1262_v44 = vpop.permute.xlu0 %220 }
  0xae   : > { %599 = vperm.xlu1 %935, %v1101_v7   ;;  %611 = vperm.xlu0 %936, %v1120_v12  }
  0xaf   : > { %v1266_v45 = vpop.permute.xlu1 %235  ;;  %v1268_v46 = vpop.permute.xlu0 %230 }
  0xb2   : > { %607 = vperm.xlu1 %935, %v1109_v9   ;;  %619 = vperm.xlu0 %936, %v1128_v14   ;;  %v504_v9 = vsub.s32 1, %v1312_v62 }
  0xb3   : > { %v1272_v47 = vpop.permute.xlu1 %245  ;;  %v1274_v48 = vpop.permute.xlu0 %240 }
  0xb4   : > { %v1350_v12 = vrot.slane %v1326_v2, %v504_v9 }
  0xb6   : > { %615 = vperm.xlu1 %935, %v1117_v11   ;;  %627 = vperm.xlu0 %936, %v1136_v16  }
  0xb7   : > { %v1278_v49 = vpop.permute.xlu1 %255  ;;  %v1280_v50 = vpop.permute.xlu0 %250 }
  0xba   : > { %623 = vperm.xlu1 %935, %v1125_v13   ;;  %635 = vperm.xlu0 %936, %v1144_v18  }
  0xbb   : > { %v1284_v51 = vpop.permute.xlu1 %265  ;;  %v1286_v52 = vpop.permute.xlu0 %260 }
  0xbe   : > { %631 = vperm.xlu1 %935, %v1133_v15   ;;  %643 = vperm.xlu0 %936, %v1152_v20   ;;  %v345_v15 = vmul.f32 %v1333_v5, %v1242_v37  ;;  %v347_v20 = vmul.f32 %v1333_v5, %v1248_v39  ;;  %v353_v37 = vmul.f32 %v1333_v5, %v1266_v45 }
  0xbf   : > { %v1290_v53 = vpop.permute.xlu1 %275  ;;  %v1292_v54 = vpop.permute.xlu0 %270  ;;  %v357_v45 = vmul.f32 %v1333_v5, %v1278_v49 }
  0xc0   : > { %v361_v49 = vmul.f32 %v1333_v5, %v1290_v53 }
  0xc2   : > { %639 = vperm.xlu1 %935, %v1141_v17   ;;  %651 = vperm.xlu0 %936, %v1160_v22  }
  0xc3   : > { %v1296_v55 = vpop.permute.xlu1 %285  ;;  %v1298_v56 = vpop.permute.xlu0 %280 }
  0xc6   : > { %647 = vperm.xlu1 %935, %v1149_v19   ;;  %659 = vperm.xlu0 %936, %v1168_v24  }
  0xc7   : > { %v1302_v57 = vpop.permute.xlu1 %295  ;;  %v1304_v58 = vpop.permute.xlu0 %290 }
  0xc8   : > { %v365_v53 = vmul.f32 %v1333_v5, %v1302_v57 }
  0xca   : > { %655 = vperm.xlu1 %935, %v1157_v21   ;;  %667 = vperm.xlu0 %936, %v1176_v26  }
  0xcb   : > { %v1308_v60 = vpop.permute.xlu1 %305  ;;  %v1310_v61 = vpop.permute.xlu0 %300 }
  0xce   : > { %663 = vperm.xlu1 %935, %v1165_v23   ;;  %675 = vperm.xlu0 %936, %v1184_v28  }
  0xcf   : > { %v1316_v63 = vpop.permute.xlu1 %315  ;;  %v1318_v0 = vpop.permute.xlu0 %310 }
  0xd0   : > { %v369_v57 = vmul.f32 %v1333_v5, %v1316_v63 }
  0xd2   : > { %671 = vperm.xlu1 %935, %v1173_v25   ;;  %683 = vperm.xlu0 %936, %v1192_v30   ;;  %v349_v25 = vmul.f32 %v1333_v5, %v1254_v41  ;;  %v351_v30 = vmul.f32 %v1333_v5, %v1260_v43  ;;  %v355_v43 = vmul.f32 %v1333_v5, %v1272_v47 }
  0xd3   : > { %v1328_v3 = vpop.permute.xlu1 %325  ;;  %v1330_v4 = vpop.permute.xlu0 %320  ;;  %v359_v47 = vmul.f32 %v1333_v5, %v1284_v51  ;;  %v363_v51 = vmul.f32 %v1333_v5, %v1296_v55  ;;  %v367_v55 = vmul.f32 %v1333_v5, %v1308_v60 }
  0xd4   : > { %v371_v60 = vmul.f32 %v1333_v5, %v1328_v3 }
  0xd6   : > { %679 = vperm.xlu1 %935, %v1181_v27   ;;  %691 = vperm.xlu0 %936, %v1200_v32  }
  0xd7   : > { %v336_v6 = vpop.permute.xlu1 %335  ;;  %v1337_v7 = vpop.permute.xlu0 %330 }
  0xd8   : > { %v1340_v8 = vmul.f32 %v1333_v5, %v336_v6 }
  0xda   : > { %687 = vperm.xlu1 %935, %v1189_v29  }
  0xdc   : > { %v1344_v10 = vpop.permute.xlu1 %379  ;;  %v1346_v11 = vpop.permute.xlu0 %375 }
  0xde   : > { %695 = vperm.xlu1 %935, %v1197_v31  }
  0xe0   : > { %v1352_v13 = vpop.permute.xlu1 %383  ;;  %v388_v14 = vpop.permute.xlu0 %387 }
  0xe1   : > { %v509_v16 = vmul.f32 %v1350_v12, %v388_v14 }
  0xe3   : > { %v1357_v17 = vadd.f32 %v509_v16, %v345_v15 }
  0xe4   : > { %v1359_v18 = vpop.permute.xlu1 %391  ;;  %v396_v19 = vpop.permute.xlu0 %395 }
  0xe5   : > { %v511_v21 = vmul.f32 %v1350_v12, %v396_v19 }
  0xe7   : > { %v1364_v22 = vadd.f32 %v511_v21, %v347_v20 }
  0xe8   : > { %v1366_v23 = vpop.permute.xlu1 %399  ;;  %v404_v24 = vpop.permute.xlu0 %403 }
  0xe9   : > { %v513_v26 = vmul.f32 %v1350_v12, %v404_v24 }
  0xeb   : > { %v1371_v27 = vadd.f32 %v513_v26, %v349_v25 }
  0xec   : > { %v1373_v28 = vpop.permute.xlu1 %407  ;;  %v412_v29 = vpop.permute.xlu0 %411 }
  0xed   : > { %v515_v31 = vmul.f32 %v1350_v12, %v412_v29 }
  0xef   : > { %v1378_v32 = vadd.f32 %v515_v31, %v351_v30 }
  0xf0   : > { %v1380_v33 = vpop.permute.xlu1 %415  ;;  %v420_v36 = vpop.permute.xlu0 %419 }
  0xf1   : > { %v517_v39 = vmul.f32 %v1350_v12, %v420_v36 }
  0xf3   : > { %v1385_v41 = vadd.f32 %v517_v39, %v353_v37 }
  0xf4   : > { %v1387_v59 = vpop.permute.xlu1 %423  ;;  %v428_v1 = vpop.permute.xlu0 %427 }
  0xf5   : > { %v519_v6 = vmul.f32 %v1350_v12, %v428_v1 }
  0xf7   : > { %v1392_v9 = vadd.f32 %v519_v6, %v355_v43 }
  0xf8   : > { %v1394_v14 = vpop.permute.xlu1 %431  ;;  %v436_v15 = vpop.permute.xlu0 %435 }
  0xf9   : > { %v521_v16 = vmul.f32 %v1350_v12, %v436_v15 }
  0xfb   : > { %v1399_v19 = vadd.f32 %v521_v16, %v357_v45 }
  0xfc   : > { %v1401_v20 = vpop.permute.xlu1 %439  ;;  %v444_v21 = vpop.permute.xlu0 %443 }
  0xfd   : > { %v523_v24 = vmul.f32 %v1350_v12, %v444_v21 }
  0xff   : > { %v1406_v25 = vadd.f32 %v523_v24, %v359_v47 }
 0x100   : > { %v1408_v26 = vpop.permute.xlu1 %447  ;;  %v452_v29 = vpop.permute.xlu0 %451 }
 0x101   : > { %v525_v30 = vmul.f32 %v1350_v12, %v452_v29 }
 0x103   : > { %v1413_v31 = vadd.f32 %v525_v30, %v361_v49 }
 0x104   : > { %v1415_v36 = vpop.permute.xlu1 %455  ;;  %v460_v37 = vpop.permute.xlu0 %459 }
 0x105   : > { %v527_v39 = vmul.f32 %v1350_v12, %v460_v37 }
 0x107   : > { %v1420_v1 = vadd.f32 %v527_v39, %v363_v51 }
 0x108   : > { %v1422_v43 = vpop.permute.xlu1 %463  ;;  %v468_v6 = vpop.permute.xlu0 %467 }
 0x109   : > { %v529_v15 = vmul.f32 %v1350_v12, %v468_v6 }
 0x10b   : > { %v1427_v45 = vadd.f32 %v529_v15, %v365_v53  ;;  %v700_v53 = vsub.s32 2, %v1312_v62  ;;  %v343_v62 = vmul.f32 %v1333_v5, %v1244_v38 }
 0x10c   : > { %v1429_v16 = vpop.permute.xlu1 %471  ;;  %v476_v21 = vpop.permute.xlu0 %475 }
 0x10d   : > { %v531_v47 = vmul.f32 %v1350_v12, %v476_v21  ;;  %v1460_v3 = vrot.slane %v1326_v2, %v700_v53  ;;  %v510_v2 = vmul.f32 %v1350_v12, %v1359_v18  ;;  %v344_v53 = vmul.f32 %v1333_v5, %v1236_v34 }
 0x10e   : > { %v348_v18 = vmul.f32 %v1333_v5, %v1256_v42 }
 0x10f   : > { %v1434_v24 = vadd.f32 %v531_v47, %v367_v55  ;;  %v507_v55 = vmul.f32 %v1350_v12, %v1344_v10 }
 0x110   : > { %v1436_v29 = vpop.permute.xlu1 %479  ;;  %v484_v49 = vpop.permute.xlu0 %483 }
 0x111   : > { %v533_v30 = vmul.f32 %v1350_v12, %v484_v49  ;;  %v506_v49 = vmul.f32 %v1350_v12, %v1346_v11  ;;  %v539_v10 = vadd.f32 %v507_v55, %v343_v62 }
 0x113   : > { %v1441_v37 = vadd.f32 %v533_v30, %v369_v57  ;;  %v342_v30 = vmul.f32 %v1333_v5, %v1238_v35  ;;  %v346_v35 = vmul.f32 %v1333_v5, %v1250_v40 }
 0x114   : > { %v1443_v51 = vpop.permute.xlu1 %487  ;;  %v492_v39 = vpop.permute.xlu0 %491 }
 0x115   : > { %v535_v6 = vmul.f32 %v1350_v12, %v492_v39  ;;  %v508_v39 = vmul.f32 %v1350_v12, %v1352_v13 }
 0x117   : > { %v1449_v15 = vadd.f32 %v535_v6, %v371_v60  ;;  %v538_v6 = vadd.f32 %v506_v49, %v342_v30  ;;  %v512_v49 = vmul.f32 %v1350_v12, %v1366_v23 }
 0x118   : > { %v1451_v21 = vpop.permute.xlu1 %495  ;;  %v500_v63 = vpop.permute.xlu0 %499 }
 0x119   : > { %v537_v47 = vmul.f32 %v1350_v12, %v500_v63 }
 0x11b   : > { %v1465_v57 = vadd.f32 %v537_v47, %v1340_v8  ;;  %v540_v47 = vadd.f32 %v508_v39, %v344_v53 }
 0x11d   : > { %1669 = vst [vmem:[#allocation5_spill] sm:$0xff] %v1465_v57  ;;  %v572_v60 = vpop.permute.xlu1 %571  ;;  %v576_v11 = vpop.permute.xlu0 %575  ;;  %v542_v57 = vadd.f32 %v510_v2, %v346_v35 }
 0x11e   : > { %v702_v38 = vmul.f32 %v1460_v3, %v572_v60  ;;  %v703_v8 = vmul.f32 %v1460_v3, %v576_v11  ;;  %v544_v60 = vadd.f32 %v512_v49, %v348_v18  ;;  %v514_v11 = vmul.f32 %v1350_v12, %v1373_v28 }
 0x11f   : > { %v516_v28 = vmul.f32 %v1350_v12, %v1380_v33  ;;  %v518_v33 = vmul.f32 %v1350_v12, %v1387_v59  ;;  %v520_v59 = vmul.f32 %v1350_v12, %v1394_v14  ;;  %v522_v14 = vmul.f32 %v1350_v12, %v1401_v20 }
 0x120   : > { %v734_v63 = vadd.f32 %v702_v38, %v538_v6  ;;  %v735_v55 = vadd.f32 %v703_v8, %v539_v10  ;;  %v350_v38 = vmul.f32 %v1333_v5, %v1262_v44  ;;  %v352_v44 = vmul.f32 %v1333_v5, %v1268_v46 }
 0x121   : > { %v580_v13 = vpop.permute.xlu1 %579  ;;  %v588_v62 = vpop.permute.xlu0 %587  ;;  %v354_v46 = vmul.f32 %v1333_v5, %v1274_v48  ;;  %v356_v48 = vmul.f32 %v1333_v5, %v1280_v50  ;;  %v358_v50 = vmul.f32 %v1333_v5, %v1286_v52  ;;  %v524_v20 = vmul.f32 %v1350_v12, %v1408_v26 }
 0x122   : > { %766 = vst [vmem:[%s1483_s30] sm:$0xff] %v734_v63  ;;  %767 = vst [vmem:[%s1483_s30 + $0x8] sm:$0xff] %v735_v55  ;;  %v704_v34 = vmul.f32 %v1460_v3, %v580_v13  ;;  %v706_v40 = vmul.f32 %v1460_v3, %v588_v62  ;;  %v546_v35 = vadd.f32 %v514_v11, %v350_v38 }
 0x123   : > { %v548_v49 = vadd.f32 %v516_v28, %v352_v44  ;;  %v552_v38 = vadd.f32 %v520_v59, %v356_v48  ;;  %v554_v28 = vadd.f32 %v522_v14, %v358_v50  ;;  %v360_v52 = vmul.f32 %v1333_v5, %v1292_v54 }
 0x124   : > { %v736_v30 = vadd.f32 %v704_v34, %v540_v47  ;;  %v738_v10 = vadd.f32 %v706_v40, %v542_v57  ;;  %v526_v26 = vmul.f32 %v1350_v12, %v1415_v36  ;;  %v362_v54 = vmul.f32 %v1333_v5, %v1298_v56 }
 0x125   : > { %v584_v39 = vpop.permute.xlu1 %583  ;;  %v596_v23 = vpop.permute.xlu0 %595  ;;  %v528_v36 = vmul.f32 %v1350_v12, %v1422_v43  ;;  %v364_v56 = vmul.f32 %v1333_v5, %v1304_v58  ;;  %v530_v43 = vmul.f32 %v1350_v12, %v1429_v16  ;;  %v366_v58 = vmul.f32 %v1333_v5, %v1310_v61 }
 0x126   : > { %768 = vst [vmem:[%s1483_s30 + $0x10] sm:$0xff] %v736_v30  ;;  %770 = vst [vmem:[%s1483_s30 + $0x20] sm:$0xff] %v738_v10  ;;  %v705_v6 = vmul.f32 %v1460_v3, %v584_v39  ;;  %v708_v2 = vmul.f32 %v1460_v3, %v596_v23  ;;  %v550_v39 = vadd.f32 %v518_v33, %v354_v46 }
 0x127   : > { %v558_v46 = vadd.f32 %v526_v26, %v362_v54  ;;  %v560_v59 = vadd.f32 %v528_v36, %v364_v56  ;;  %v532_v16 = vmul.f32 %v1350_v12, %v1436_v29  ;;  %v368_v61 = vmul.f32 %v1333_v5, %v1318_v0 }
 0x128   : > { %v737_v42 = vadd.f32 %v705_v6, %v1357_v17  ;;  %v740_v57 = vadd.f32 %v708_v2, %v544_v60  ;;  %v534_v29 = vmul.f32 %v1350_v12, %v1443_v51  ;;  %v370_v0 = vmul.f32 %v1333_v5, %v1330_v4 }
 0x129   : > { %v592_v8 = vpop.permute.xlu1 %591  ;;  %v604_v53 = vpop.permute.xlu0 %603  ;;  %v564_v50 = vadd.f32 %v532_v16, %v368_v61  ;;  %v536_v51 = vmul.f32 %v1350_v12, %v1451_v21  ;;  %v372_v4 = vmul.f32 %v1333_v5, %v1337_v7 }
 0x12a   : > { %769 = vst [vmem:[%s1483_s30 + $0x18] sm:$0xff] %v737_v42  ;;  %772 = vst [vmem:[%s1483_s30 + $0x30] sm:$0xff] %v740_v57  ;;  %v707_v63 = vmul.f32 %v1460_v3, %v592_v8  ;;  %v710_v55 = vmul.f32 %v1460_v3, %v604_v53 }
 0x12b   : > { %v568_v12 = vadd.f32 %v536_v51, %v372_v4 }
 0x12c   : > { %v739_v17 = vadd.f32 %v707_v63, %v1364_v22  ;;  %v742_v47 = vadd.f32 %v710_v55, %v546_v35 }
 0x12d   : > { %v600_v13 = vpop.permute.xlu1 %599  ;;  %v612_v62 = vpop.permute.xlu0 %611 }
 0x12e   : > { %771 = vst [vmem:[%s1483_s30 + $0x28] sm:$0xff] %v739_v17  ;;  %774 = vst [vmem:[%s1483_s30 + $0x40] sm:$0xff] %v742_v47  ;;  %v709_v34 = vmul.f32 %v1460_v3, %v600_v13  ;;  %v712_v40 = vmul.f32 %v1460_v3, %v612_v62  ;;  %v556_v13 = vadd.f32 %v524_v20, %v360_v52 }
 0x12f   : > { %v566_v20 = vadd.f32 %v534_v29, %v370_v0 }
 0x130   : > { %v741_v22 = vadd.f32 %v709_v34, %v1371_v27  ;;  %v744_v18 = vadd.f32 %v712_v40, %v548_v49 }
 0x131   : > { %v608_v30 = vpop.permute.xlu1 %607  ;;  %v620_v10 = vpop.permute.xlu0 %619 }
 0x132   : > { %773 = vst [vmem:[%s1483_s30 + $0x38] sm:$0xff] %v741_v22  ;;  %776 = vst [vmem:[%s1483_s30 + $0x50] sm:$0xff] %v744_v18  ;;  %v711_v23 = vmul.f32 %v1460_v3, %v608_v30  ;;  %v714_v60 = vmul.f32 %v1460_v3, %v620_v10 }
 0x134   : > { %v743_v27 = vadd.f32 %v711_v23, %v1378_v32  ;;  %v746_v11 = vadd.f32 %v714_v60, %v550_v39 }
 0x135   : > { %v616_v6 = vpop.permute.xlu1 %615  ;;  %v628_v2 = vpop.permute.xlu0 %627 }
 0x136   : > { %775 = vst [vmem:[%s1483_s30 + $0x48] sm:$0xff] %v743_v27  ;;  %778 = vst [vmem:[%s1483_s30 + $0x60] sm:$0xff] %v746_v11  ;;  %v713_v42 = vmul.f32 %v1460_v3, %v616_v6  ;;  %v716_v57 = vmul.f32 %v1460_v3, %v628_v2  ;;  %v562_v6 = vadd.f32 %v530_v43, %v366_v58 }
 0x138   : > { %v745_v32 = vadd.f32 %v713_v42, %v1385_v41  ;;  %v748_v8 = vadd.f32 %v716_v57, %v552_v38 }
 0x139   : > { %v624_v53 = vpop.permute.xlu1 %623  ;;  %v636_v35 = vpop.permute.xlu0 %635 }
 0x13a   : > { %777 = vst [vmem:[%s1483_s30 + $0x58] sm:$0xff] %v745_v32  ;;  %780 = vst [vmem:[%s1483_s30 + $0x70] sm:$0xff] %v748_v8  ;;  %v715_v63 = vmul.f32 %v1460_v3, %v624_v53  ;;  %v718_v55 = vmul.f32 %v1460_v3, %v636_v35 }
 0x13c   : > { %v747_v41 = vadd.f32 %v715_v63, %v1392_v9  ;;  %v750_v44 = vadd.f32 %v718_v55, %v554_v28 }
 0x13d   : > { %v632_v17 = vpop.permute.xlu1 %631  ;;  %v644_v47 = vpop.permute.xlu0 %643 }
 0x13e   : > { %779 = vst [vmem:[%s1483_s30 + $0x68] sm:$0xff] %v747_v41  ;;  %782 = vst [vmem:[%s1483_s30 + $0x80] sm:$0xff] %v750_v44  ;;  %v717_v62 = vmul.f32 %v1460_v3, %v632_v17  ;;  %v720_v49 = vmul.f32 %v1460_v3, %v644_v47 }
 0x140   : > { %v749_v9 = vadd.f32 %v717_v62, %v1399_v19  ;;  %v752_v33 = vadd.f32 %v720_v49, %v556_v13 }
 0x141   : > { %v640_v34 = vpop.permute.xlu1 %639  ;;  %v652_v40 = vpop.permute.xlu0 %651 }
 0x142   : > { %781 = vst [vmem:[%s1483_s30 + $0x78] sm:$0xff] %v749_v9  ;;  %784 = vst [vmem:[%s1483_s30 + $0x90] sm:$0xff] %v752_v33  ;;  %v719_v22 = vmul.f32 %v1460_v3, %v640_v34  ;;  %v722_v18 = vmul.f32 %v1460_v3, %v652_v40 }
 0x144   : > { %v751_v19 = vadd.f32 %v719_v22, %v1406_v25  ;;  %v754_v30 = vadd.f32 %v722_v18, %v558_v46 }
 0x145   : > { %v648_v10 = vpop.permute.xlu1 %647  ;;  %v660_v39 = vpop.permute.xlu0 %659 }
 0x146   : > { %783 = vst [vmem:[%s1483_s30 + $0x88] sm:$0xff] %v751_v19  ;;  %786 = vst [vmem:[%s1483_s30 + $0xa0] sm:$0xff] %v754_v30  ;;  %v721_v23 = vmul.f32 %v1460_v3, %v648_v10  ;;  %v724_v60 = vmul.f32 %v1460_v3, %v660_v39 }
 0x148   : > { %v753_v25 = vadd.f32 %v721_v23, %v1413_v31  ;;  %v756_v48 = vadd.f32 %v724_v60, %v560_v59 }
 0x149   : > { %v656_v27 = vpop.permute.xlu1 %655  ;;  %v668_v11 = vpop.permute.xlu0 %667 }
 0x14a   : > { %785 = vst [vmem:[%s1483_s30 + $0x98] sm:$0xff] %v753_v25  ;;  %788 = vst [vmem:[%s1483_s30 + $0xb0] sm:$0xff] %v756_v48  ;;  %v723_v2 = vmul.f32 %v1460_v3, %v656_v27  ;;  %v726_v38 = vmul.f32 %v1460_v3, %v668_v11 }
 0x14c   : > { %v755_v31 = vadd.f32 %v723_v2, %v1420_v1  ;;  %v758_v14 = vadd.f32 %v726_v38, %v562_v6 }
 0x14d   : > { %v664_v42 = vpop.permute.xlu1 %663  ;;  %v676_v57 = vpop.permute.xlu0 %675 }
 0x14e   : > { %787 = vst [vmem:[%s1483_s30 + $0xa8] sm:$0xff] %v755_v31  ;;  %790 = vst [vmem:[%s1483_s30 + $0xc0] sm:$0xff] %v758_v14  ;;  %v725_v32 = vmul.f32 %v1460_v3, %v664_v42  ;;  %v728_v8 = vmul.f32 %v1460_v3, %v676_v57 }
 0x150   : > { %v757_v1 = vadd.f32 %v725_v32, %v1427_v45  ;;  %v760_v53 = vadd.f32 %v728_v8, %v564_v50 }
 0x151   : > { %v672_v35 = vpop.permute.xlu1 %671  ;;  %v684_v28 = vpop.permute.xlu0 %683 }
 0x152   : > { %789 = vst [vmem:[%s1483_s30 + $0xb8] sm:$0xff] %v757_v1  ;;  %792 = vst [vmem:[%s1483_s30 + $0xd0] sm:$0xff] %v760_v53  ;;  %v727_v63 = vmul.f32 %v1460_v3, %v672_v35  ;;  %v730_v55 = vmul.f32 %v1460_v3, %v684_v28 }
 0x154   : > { %v759_v45 = vadd.f32 %v727_v63, %v1434_v24  ;;  %v762_v52 = vadd.f32 %v730_v55, %v566_v20 }
 0x155   : > { %v680_v41 = vpop.permute.xlu1 %679  ;;  %v692_v44 = vpop.permute.xlu0 %691 }
 0x156   : > { %791 = vst [vmem:[%s1483_s30 + $0xc8] sm:$0xff] %v759_v45  ;;  %794 = vst [vmem:[%s1483_s30 + $0xe0] sm:$0xff] %v762_v52  ;;  %v729_v21 = vmul.f32 %v1460_v3, %v680_v41  ;;  %v732_v17 = vmul.f32 %v1460_v3, %v692_v44 }
 0x158   : > { %v761_v47 = vadd.f32 %v729_v21, %v1441_v37  ;;  %v764_v5 = vadd.f32 %v732_v17, %v568_v12  ;;  %v1670_v37 = vld [vmem:[#allocation5_spill] sm:$0xff] }
 0x159   : > { %v688_v7 = vpop.permute.xlu1 %687 }
 0x15a   : > { %793 = vst [vmem:[%s1483_s30 + $0xd8] sm:$0xff] %v761_v47  ;;  %796 = vst [vmem:[%s1483_s30 + $0xf0] sm:$0xff] %v764_v5  ;;  %v731_v24 = vmul.f32 %v1460_v3, %v688_v7 }
 0x15c   : > { %v763_v13 = vadd.f32 %v731_v24, %v1449_v15 }
 0x15d   : > { %v696_v26 = vpop.permute.xlu1 %695 }
 0x15e   : > { %795 = vst [vmem:[%s1483_s30 + $0xe8] sm:$0xff] %v763_v13  ;;  %v733_v62 = vmul.f32 %v1460_v3, %v696_v26 }
 0x160   : > { %v765_v49 = vadd.f32 %v733_v62, %v1670_v37 }
 0x162   : > { %797 = vst [vmem:[%s1483_s30 + $0xf8] sm:$0xff] %v765_v49 }
 0x163   : > { %950 = shalt.err (!%p947_p3)
}
 0x164   : > { %s951_s21 = scalar_lea.hbm %s1615_s7, 4096  ;;  %s955_s24 = scalar_lea.hbm %s1666_s2, 8192 }
 0x165   : > { %p952_p4 = scmp.ne.s32.totalorder %s1615_s7, %s951_s21  ;;  %p956_p9 = scmp.lt.u32.totalorder %s1615_s7, %s1666_s2 }
 0x166   : > { %p957_p10 = scmp.lt.u32.totalorder %s955_s24, %s951_s21  ;;  %p959_p12 = scmp.lt.u32.totalorder %s951_s21, %s1615_s7 }
 0x167   : > { %p953_p7 = pnand %p952_p4, %p1060_p5 }
 0x168   : > { %p958_p11 = por %p957_p10, %p956_p9 }
 0x169   : > { %p954_p8 = pneg %p953_p7 }
 0x16a   : > { %p960_p13 = por %p959_p12, %p958_p11 }
 0x16c   : > { %p961_p0 = pnand %p960_p13, %p954_p8 }
 0x16e   : > { %964 = shalt.err (!%p961_p0)
}
 0x16f   : > { %s1005_s27 = smov 128   ;;  %s1006_s28 = smov 8  }
 0x170   : > { %887 = dma.vmem_to_hbm [thread:$0]  (%p1060_p5), %s1617_s4, 4096, %s1615_s7, %s1623_s8, %s1005_s27, %s1005_s27, %s1006_s28  }
 0x171 PF: > { %p893_p1 = scmp.ge.s32.totalorder %s999_s12, 2  ;;  %s827_s29 = sand.u32 1, %s987_s9  }
 0x172   : > { %s828_s30 = scalar_lea.sflag [#allocation3], %s827_s29 }
 0x173   : > { %p890_p2 = pnand %p893_p1, %p1064_p6 }
 0x175   : > { %982 = dma.done.wait (!%p890_p2), %s828_s30, 4096  }
 0x176   : > { %984 = vsyncadd (!%p890_p2), %s828_s30, 4294963200  ;;  %p12_p3 = scmp.ge.s32.totalorder %s1047_s15, 4   ;;  %s1671_s9 = smov %s991_s10 }
 0x177   : > { %s1672_s10 = smov %s995_s11  ;;  %s1673_s11 = smov %s1058_s18 }
 0x178   : > { %s1674_s12 = smov %s1047_s15  ;;  %14 = sbr.rel (!%p12_p3) target bundleno = 3 (0x3), region = 63 }
 0x17f   :  { %833 = vsyncpa [#allocation3], 1 }
 0x180   :  { %835 = vsyncpa [#allocation3 + $0x1], 1 }

</bundles_post_ra>
